<compile_context>
chip_gen: v7x
topology: tpu7x:2x2x1
jax: 0.10.0
libtpu: 0.0.40
codegen_flags: <defaults>
</compile_context>

<pallas_src>
import functools

import jax
import jax.numpy as jnp
from jax.experimental import pallas as pl
from jax.experimental.pallas import tpu as pltpu

HIDDEN = 20
NUM_OUTPUTS = 9


def _fc_kernel(x_ref, w0_ref, b0_ref, w1_ref, b1_ref, out_t_ref):
    # x_ref:     (TILE_B, D)             current batch tile
    # w0_ref:    (HIDDEN, D)             resident (torch linear0.weight layout)
    # b0_ref:    (HIDDEN, 1)             resident
    # w1_ref:    (NUM_OUTPUTS, HIDDEN)   resident (torch linear1.weight layout)
    # b1_ref:    (NUM_OUTPUTS, 1)        resident
    # out_t_ref: (NUM_OUTPUTS, TILE_B)   transposed output tile (lane-dense)
    x = x_ref[...]

    # h^T = tanh(W0 @ x^T + b0), computed directly in the lane-dense
    # (HIDDEN, TILE_B) layout: tanh runs at 128/128 lane density and the second
    # matmul consumes h^T on its contracting axis with no extra relayout.
    pre_t = jax.lax.dot_general(
        w0_ref[...], x,
        dimension_numbers=(((1,), (1,)), ((), ())),   # contract D with D
        preferred_element_type=jnp.float32,
    )                                                  # (HIDDEN, TILE_B)
    h_t = jnp.tanh(pre_t + b0_ref[...])                # bias broadcast over lanes

    out_t = jnp.dot(w1_ref[...], h_t,
                    preferred_element_type=jnp.float32) + b1_ref[...]
    out_t_ref[...] = out_t.astype(out_t_ref.dtype)     # (NUM_OUTPUTS, TILE_B)


def _pick_tile_b(batch, input_size, buffer_depth=3):
    """Size the batch tile from actual pipelined-buffer traffic.

    Per-row traffic is only (input_size + 9) * 4 bytes, so the fixed ~0.35 us
    per-grid-step overhead dominates unless tiles are tens of thousands of
    rows.  Budget ~20 MiB of VMEM for the `buffer_depth`-deep x/out buffers
    (v7x: 64 MiB physical / 32 MiB scoped), cap at 64K rows, and keep at least
    2 grid steps so the batch axis can be sharded across v7x's 2 TensorCores.
    """
    if batch <= 1024:
        return batch
    budget_bytes = 20 * 1024 * 1024
    per_row_bytes = 4 * buffer_depth * (input_size + NUM_OUTPUTS)
    tile = budget_bytes // max(per_row_bytes, 1)
    tile = min(tile, 64 * 1024)
    # At least two grid steps (round half-batch up to a 128 multiple).
    half = (((batch + 1) // 2) + 127) // 128 * 128
    tile = min(tile, half)
    return max(128, (tile // 128) * 128)


@functools.partial(jax.jit, static_argnames=("tile_b", "multibuffer"))
def _fc_forward_t(x, w0, b0, w1, b1, *, tile_b, multibuffer):
    """Returns the transposed output (NUM_OUTPUTS, B)."""
    batch, input_size = x.shape
    tb = tile_b
    grid = (pl.cdiv(batch, tb),)

    cost = pl.CostEstimate(
        flops=2 * batch * (input_size * HIDDEN + HIDDEN * NUM_OUTPUTS),
        transcendentals=batch * HIDDEN,
        bytes_accessed=4 * (batch * (input_size + NUM_OUTPUTS)
                            + input_size * HIDDEN + HIDDEN
                            + HIDDEN * NUM_OUTPUTS + NUM_OUTPUTS),
    )

    if multibuffer:
        x_spec = pl.BlockSpec((tb, input_size), lambda i: (i, 0),
                              pipeline_mode=pl.Buffered(3))
        out_spec = pl.BlockSpec((NUM_OUTPUTS, tb), lambda i: (0, i),
                                pipeline_mode=pl.Buffered(3))
    else:
        x_spec = pl.BlockSpec((tb, input_size), lambda i: (i, 0))
        out_spec = pl.BlockSpec((NUM_OUTPUTS, tb), lambda i: (0, i))

    return pl.pallas_call(
        _fc_kernel,
        out_shape=jax.ShapeDtypeStruct((NUM_OUTPUTS, batch), jnp.float32),
        grid=grid,
        in_specs=[
            x_spec,                                                  # x: batch-tiled
            pl.BlockSpec((HIDDEN, input_size), lambda i: (0, 0)),    # w0: resident
            pl.BlockSpec((HIDDEN, 1), lambda i: (0, 0)),             # b0: resident
            pl.BlockSpec((NUM_OUTPUTS, HIDDEN), lambda i: (0, 0)),   # w1: resident
            pl.BlockSpec((NUM_OUTPUTS, 1), lambda i: (0, 0)),        # b1: resident
        ],
        out_specs=out_spec,                                          # lane-dense store
        compiler_params=pltpu.CompilerParams(
            dimension_semantics=("parallel",),    # megacore sharding on v7x
            vmem_limit_bytes=32 * 1024 * 1024,    # <= 48 MiB headroom rule on v7x
        ),
        cost_estimate=cost,
    )(x, w0, b0, w1, b1)


def fc_network_forward(x, w0, b0, w1, b1, *, tile_b=None, transpose_output=True):
    """x: (B, D) f32; w0: (20, D); b0: (20, 1); w1: (9, 20); b1: (9, 1).

    Returns (B, 9) by default (module semantics).  Pass transpose_output=False
    to take the kernel-native (9, B) layout and skip the extra HBM pass.
    """
    batch, input_size = x.shape
    tb = tile_b if tile_b is not None else _pick_tile_b(batch, input_size)
    multibuffer = pl.cdiv(batch, tb) >= 3
    try:
        out_t = _fc_forward_t(x, w0, b0, w1, b1, tile_b=tb, multibuffer=multibuffer)
    except Exception:
        # Fallback: drop the Buffered(3) pipeline hint if this JAX/Mosaic
        # version rejects pipeline_mode — double-buffered default still works.
        out_t = _fc_forward_t(x, w0, b0, w1, b1, tile_b=tb, multibuffer=False)
    return out_t.T if transpose_output else out_t


def init_params(key, input_size):
    """Deterministic init matching the torch module's layouts.

    linear0.weight: xavier_normal_ over (20, input_size) -> stored as-is
    linear1.weight: xavier_normal_ over (9, 20)          -> stored as-is
    biases: small deterministic values (torch default is uniform; shapes are
    what matter here) stored as column vectors for lane-broadcast in-kernel.
    """
    k0, k1, k2, k3 = jax.random.split(key, 4)
    std0 = (2.0 / (input_size + HIDDEN)) ** 0.5
    std1 = (2.0 / (HIDDEN + NUM_OUTPUTS)) ** 0.5
    w0 = std0 * jax.random.normal(k0, (HIDDEN, input_size), dtype=jnp.float32)
    w1 = std1 * jax.random.normal(k1, (NUM_OUTPUTS, HIDDEN), dtype=jnp.float32)
    b0 = 0.01 * jax.random.normal(k2, (HIDDEN, 1), dtype=jnp.float32)
    b1 = 0.01 * jax.random.normal(k3, (NUM_OUTPUTS, 1), dtype=jnp.float32)
    return w0, b0, w1, b1


def _reference(x, w0, b0, w1, b1):
    h = jnp.tanh(x @ w0.T + b0[:, 0])
    return h @ w1.T + b1[:, 0]


if __name__ == "__main__":
    key = jax.random.PRNGKey(0)
    kx, kp = jax.random.split(key)

    input_size = 16
    w0, b0, w1, b1 = init_params(kp, input_size)

    # Small whole-array case, a multi-tile (3-deep-pipeline) case, and a
    # non-divisible tail case.
    cases = ((8, None), (384, 128), (200, 128))
    for batch, tile in cases:
        x = jax.random.normal(jax.random.fold_in(kx, batch),
                              (batch, input_size), dtype=jnp.float32)
        out = jax.block_until_ready(
            fc_network_forward(x, w0, b0, w1, b1, tile_b=tile))
        ref = _reference(x, w0, b0, w1, b1)
        assert out.shape == (batch, NUM_OUTPUTS), (out.shape, batch)
        assert jnp.allclose(out, ref, atol=1e-3, rtol=1e-3), \
            f"mismatch vs JAX reference for batch={batch}, tile={tile}"

    # Kernel-native transposed output path (no wrapper-side HBM transpose).
    x = jax.random.normal(jax.random.fold_in(kx, 7), (384, input_size),
                          dtype=jnp.float32)
    out_t = jax.block_until_ready(
        fc_network_forward(x, w0, b0, w1, b1, tile_b=128, transpose_output=False))
    assert out_t.shape == (NUM_OUTPUTS, 384)
    assert jnp.allclose(out_t.T, _reference(x, w0, b0, w1, b1),
                        atol=1e-3, rtol=1e-3)

    print("KERNEL_OK")
</pallas_src>

<mosaic_0001>
module attributes {stable_mosaic.version = 11 : i64} {
  func.func @_fc_kernel(%arg0: i32, %arg1: memref<8x16xf32, #tpu.memory_space<vmem>>, %arg2: memref<20x16xf32, #tpu.memory_space<vmem>>, %arg3: memref<20x1xf32, #tpu.memory_space<vmem>>, %arg4: memref<9x20xf32, #tpu.memory_space<vmem>>, %arg5: memref<9x1xf32, #tpu.memory_space<vmem>>, %arg6: memref<9x8xf32, #tpu.memory_space<vmem>>) attributes {dimension_semantics = [#tpu.dimension_semantics<parallel>], iteration_bounds = array<i64: 1>, scalar_prefetch = 0 : i64, scratch_operands = 0 : i64, tpu.core_type = #tpu.core_type<tc>, window_params = [{transform_indices = @transform_0, window_bounds = array<i64: 8, 16>}, {pipeline_mode = #tpu.pipeline_mode<synchronous>, transform_indices = @transform_1, window_bounds = array<i64: 20, 16>}, {pipeline_mode = #tpu.pipeline_mode<synchronous>, transform_indices = @transform_2, window_bounds = array<i64: 20, 1>}, {pipeline_mode = #tpu.pipeline_mode<synchronous>, transform_indices = @transform_3, window_bounds = array<i64: 9, 20>}, {pipeline_mode = #tpu.pipeline_mode<synchronous>, transform_indices = @transform_4, window_bounds = array<i64: 9, 1>}, {transform_indices = @transform_5, window_bounds = array<i64: 9, 8>}]} {
    %c0 = arith.constant 0 : index
    %c0_0 = arith.constant 0 : index
    %0 = vector.load %arg1[%c0, %c0_0] : memref<8x16xf32, #tpu.memory_space<vmem>>, vector<8x16xf32>
    %c0_1 = arith.constant 0 : index
    %c0_2 = arith.constant 0 : index
    %1 = vector.load %arg2[%c0_1, %c0_2] : memref<20x16xf32, #tpu.memory_space<vmem>>, vector<20x16xf32>
    %cst = arith.constant dense<0.000000e+00> : vector<20x8xf32>
    %2 = tpu.matmul %1, %0, %cst {dimension_numbers = #tpu.dot_dimension_numbers<[1], [1], [0], [0], [0, 0, 1, 0], [], []>} : vector<20x16xf32>, vector<8x16xf32>, vector<20x8xf32> -> vector<20x8xf32>
    %c0_3 = arith.constant 0 : index
    %c0_4 = arith.constant 0 : index
    %3 = vector.load %arg3[%c0_3, %c0_4] : memref<20x1xf32, #tpu.memory_space<vmem>>, vector<20x1xf32>
    %4 = vector.broadcast %3 : vector<20x1xf32> to vector<20x8xf32>
    %5 = arith.addf %2, %4 : vector<20x8xf32>
    %6 = math.tanh %5 : vector<20x8xf32>
    %c0_5 = arith.constant 0 : index
    %c0_6 = arith.constant 0 : index
    %7 = vector.load %arg4[%c0_5, %c0_6] : memref<9x20xf32, #tpu.memory_space<vmem>>, vector<9x20xf32>
    %cst_7 = arith.constant dense<0.000000e+00> : vector<9x8xf32>
    %8 = tpu.matmul %7, %6, %cst_7 {dimension_numbers = #tpu.dot_dimension_numbers<[1], [0], [0], [1], [0, 0, 1, 1], [], []>} : vector<9x20xf32>, vector<20x8xf32>, vector<9x8xf32> -> vector<9x8xf32>
    %c0_8 = arith.constant 0 : index
    %c0_9 = arith.constant 0 : index
    %9 = vector.load %arg5[%c0_8, %c0_9] : memref<9x1xf32, #tpu.memory_space<vmem>>, vector<9x1xf32>
    %10 = vector.broadcast %9 : vector<9x1xf32> to vector<9x8xf32>
    %11 = arith.addf %8, %10 : vector<9x8xf32>
    %c0_10 = arith.constant 0 : index
    %c0_11 = arith.constant 0 : index
    %12 = vector.load %arg6[%c0_10, %c0_11] : memref<9x8xf32, #tpu.memory_space<vmem>>, vector<9x8xf32>
    tpu.vector_store %arg6[%c0_10, %c0_11], %11 {strides = array<i32>} : memref<9x8xf32, #tpu.memory_space<vmem>>, vector<9x8xf32>,
    return
  }
  func.func @transform_0(%arg0: i32) -> (i32, i32) {
    %c0_i32 = arith.constant 0 : i32
    %c0_i32_0 = arith.constant 0 : i32
    return %arg0, %c0_i32 : i32, i32
  }
  func.func @transform_1(%arg0: i32) -> (i32, i32) {
    %c0_i32 = arith.constant 0 : i32
    %c0_i32_0 = arith.constant 0 : i32
    %c0_i32_1 = arith.constant 0 : i32
    return %c0_i32, %c0_i32_0 : i32, i32
  }
  func.func @transform_2(%arg0: i32) -> (i32, i32) {
    %c0_i32 = arith.constant 0 : i32
    %c0_i32_0 = arith.constant 0 : i32
    %c0_i32_1 = arith.constant 0 : i32
    return %c0_i32, %c0_i32_0 : i32, i32
  }
  func.func @transform_3(%arg0: i32) -> (i32, i32) {
    %c0_i32 = arith.constant 0 : i32
    %c0_i32_0 = arith.constant 0 : i32
    %c0_i32_1 = arith.constant 0 : i32
    return %c0_i32, %c0_i32_0 : i32, i32
  }
  func.func @transform_4(%arg0: i32) -> (i32, i32) {
    %c0_i32 = arith.constant 0 : i32
    %c0_i32_0 = arith.constant 0 : i32
    %c0_i32_1 = arith.constant 0 : i32
    return %c0_i32, %c0_i32_0 : i32, i32
  }
  func.func @transform_5(%arg0: i32) -> (i32, i32) {
    %c0_i32 = arith.constant 0 : i32
    %c0_i32_0 = arith.constant 0 : i32
    return %c0_i32, %arg0 : i32, i32
  }
}

</mosaic_0001>

<bundles_post_ra>
// kernel: _fc_forward_t.1
= control target key start
LH: loop header
LB: loop body
LE: loop exit
PB: predicated region body
PF: predicated region fallthrough
CT: control target
= control target key end

     0   :  { %vm42_vm0 = vcmask 130048   ;;  %v297_v0 = vmov 0.0   ;;  %vm298_vm1 = vmmov 0   ;;  %v299_v3 = vmov 0   ;;  %s378_s0 = inlined_call_operand.vmem [shape: f32[8,16], index: 0, kind: input, shape index: {}]   ;;  %s379_s1 = inlined_call_operand.vmem [shape: f32[20,16], index: 1, kind: input, shape index: {}]   ;;  %s380_s2 = inlined_call_operand.vmem [shape: f32[20,1], index: 2, kind: input, shape index: {}]   ;;  %s381_s4 = inlined_call_operand.vmem [shape: f32[9,1], index: 4, kind: input, shape index: {}]   ;;  %s382_s3 = inlined_call_operand.vmem [shape: f32[9,20], index: 3, kind: input, shape index: {}]   ;;  %s383_s5 = inlined_call_operand.vmem [shape: f32[9,8], index: 5, kind: output, shape index: {}]  }
   0x1   :  { %262 = vmatprep.subr.mxu0 %v297_v0  ;;  %v20_v1 = vld [vmem:[%s378_s0] sm:$0xff]  ;;  %264 = vmatprep.mubr.msk.f32.mxu0 %vm298_vm1, %v297_v0  ;;  %v26_v5 = vld [vmem:[%s380_s2 + $0x10] sm:$0xf]  ;;  %v25_v6 = vld [vmem:[%s380_s2 + $0x8] sm:$0xff]  ;;  %vm152_vm2 = vcmask 162816   ;;  %vm159_vm3 = vcmask 1043456  }
   0x2   :  { %263 = vmatpush3.xpose.msk.msra.mxu0 %vm42_vm0, %v20_v1  ;;  %v21_v2 = vld [vmem:[%s379_s1] sm:$0xff]  ;;  %289 = vset.pattern.permute.xlu0 %v299_v3  ;;  %v22_v8 = vld [vmem:[%s379_s1 + $0x8] sm:$0xff]  ;;  %v23_v10 = vld [vmem:[%s379_s1 + $0x10] sm:$0xf]  ;;  %vm240_vm4 = vcmask 57344   ;;  %vm238_vm5 = vcmask 64512  }
   0x3   :  { %v24_v4 = vld [vmem:[%s380_s2] sm:$0xff]  ;;  %290 = vset.pattern.permute.xlu1 %v299_v3  ;;  %v141_v9 = vld [vmem:[%s381_s4 + $0x8] sm:$0x1] }
   0x4   :  { %29 = vperm.xlu0 %289, %v24_v4   ;;  %39 = vperm.xlu1 %290, %v26_v5   ;;  %v140_v7 = vld [vmem:[%s381_s4] sm:$0xff]  ;;  %v139_v28 = vld [vmem:[%s382_s3 + $0x8] sm:$0x1] }
   0x5   :  { %265 = vmatmul.mubr.msk.f32.vlgmr.msra.gmra.mrb[0].mxu0 %vm42_vm0, %v21_v2  ;;  %v138_v11 = vld [vmem:[%s382_s3] sm:$0xff] }
   0x6   :  { %267 = vmatprep.mubr.msk.f32.mxu0 %vm298_vm1, %v297_v0  ;;  %279 = vmatprep.mubr.msk.f32.mxu1 %vm152_vm2, %v138_v11 }
   0x8   :  { %34 = vperm.xlu0 %289, %v25_v6   ;;  %144 = vperm.xlu1 %290, %v140_v7  }
   0x9   :  { %268 = vmatmul.mubr.msk.f32.gmra.mrb[2].mxu0 %vm42_vm0, %v22_v8 }
   0xa   :  { %270 = vmatprep.mubr.msk.f32.mxu0 %vm298_vm1, %v297_v0 }
   0xc   :  { %149 = vperm.xlu0 %289, %v141_v9  }
   0xd   :  { %271 = vmatmul.mubr.msk.f32.gmra.mrb[4].mxu0 %vm42_vm0, %v23_v10 }
  0x83   :  { %v30_v12 = vpop.permute.xlu0 %29  ;;  %v40_v20 = vpop.permute.xlu1 %39 }
  0x87   :  { %v35_v16 = vpop.permute.xlu0 %34  ;;  %v145_v31 = vpop.permute.xlu1 %144 }
  0x8b   :  { %v150_v29 = vpop.permute.xlu0 %149 }
  0xd8   :  { %v121_v13 = vpop.f32.mrb[0].mxu0 }
  0xd9   :  { %v266_v14 = vpop.f32.mrb[1].mxu0  ;;  %v122_v15 = vadd.f32 %v121_v13, %v30_v12 }
  0xdb   :  { %291 = vtanh.f32 %v122_v15 }
  0xdc   :  { %v126_v17 = vpop.f32.mrb[2].mxu0 }
  0xdd   :  { %v127_v18 = vadd.f32 %v126_v17, %v35_v16  ;;  %v269_v19 = vpop.f32.mrb[3].mxu0 }
  0xdf   :  { %293 = vtanh.f32 %v127_v18 }
  0xe0   :  { %v131_v21 = vpop.f32.mrb[4].mxu0 }
  0xe1   :  { %v132_v22 = vadd.f32 %v131_v21, %v40_v20  ;;  %v272_v23 = vpop.f32.mrb[5].mxu0 }
  0xe3   :  { %295 = vtanh.f32 %v132_v22 }
  0xe5   :  { %v292_v24 = vpop.eup %291 }
  0xe9   :  { %v294_v25 = vpop.eup %293 }
  0xea   :  { %v282_v26 = vpack.c.bf16 %v294_v25, %v292_v24 }
  0xec   :  { %283 = vmatprep.subr.bf16.mxu1 %v282_v26 }
  0xed   :  { %v296_v27 = vpop.eup %295  ;;  %285 = vmatpush3.bf16.msra.mxu1 %v282_v26 }
  0xee   :  { %277 = vmatprep.subr.msk.mxu1 %vm159_vm3, %v296_v27 }
  0xf1   :  { %278 = vmatpush3.msk.msra.mxu1 %vm159_vm3, %v296_v27 }
  0xf2   :  { %280 = vmatmul.mubr.msk.f32.vlgmr.msra.gmra.mrb[0].mxu1 %vm152_vm2, %v139_v28 }
 0x1c5   :  { %v281_v30 = vpop.f32.mrb[0].mxu1 }
 0x1c6   :  { %v235_v32 = vadd.f32 %v281_v30, %v150_v29  ;;  %v229_v33 = vpop.f32.mrb[1].mxu1 }
 0x1c7   :  { %v230_v34 = vadd.f32 %v229_v33, %v145_v31 }
 0x1c8   :  { %241 = vst.msk [vmem:[%s383_s5 + $0x8] sm:$0x1] %vm240_vm4, %v235_v32 }
 0x1c9   :  { %239 = vst.msk [vmem:[%s383_s5] sm:$0xff] %vm238_vm5, %v230_v34 }

</bundles_post_ra>
